<compile_context>
chip_gen: v6e
topology: v6e:2x2x1
jax: 0.10.0
libtpu: 0.0.40
codegen_flags: <defaults>
</compile_context>

<pallas_src>
import functools

import jax
import jax.numpy as jnp
from jax import lax
from jax.experimental import pallas as pl
from jax.experimental.pallas import tpu as pltpu

# Matmul-input dtype (accumulation is always float32).  bf16 roughly 2-3x MXU
# throughput on v6e/v7x and halves HBM/VMEM traffic; use jnp.float32 for
# exact-f32 matmul semantics.
MXU_DTYPE = jnp.bfloat16
_ROW_TILE = 256                      # row tile for the pre / windup kernels
_VMEM_LIMIT = 32 * 1024 * 1024       # leaves headroom under v7x's 64 MiB VMEM


def _mm(a, b):
    """MXU matmul: MXU_DTYPE inputs, float32 accumulation."""
    return jnp.dot(a.astype(MXU_DTYPE), b.astype(MXU_DTYPE),
                   preferred_element_type=jnp.float32)


# ----------------------------------------------------------------------------
# Kernel 1: fused pre_embedding  (Linear(1,D)+ReLU, Linear(D,D)+ReLU)
# ----------------------------------------------------------------------------
def _pre_kernel(x_ref, w1_ref, b1_ref, w2_ref, b2_ref, o_ref):
    # Din == 1 layer: outer product done as a VPU broadcast mul-add
    # (a K=1 MXU matmul would use <1% of the systolic array).
    h = jnp.maximum(x_ref[...] * w1_ref[...] + b1_ref[...], 0.0)       # (tm, D)
    h = _mm(h, w2_ref[...]) + b2_ref[...]                              # (tm, D)
    o_ref[...] = jnp.maximum(h, 0.0)


def pre_embedding(x, w1, b1, w2, b2):
    """x: (N, 1) -> (N, D)."""
    n = x.shape[0]
    d = w1.shape[1]
    tm = min(_ROW_TILE, n)
    return pl.pallas_call(
        _pre_kernel,
        out_shape=jax.ShapeDtypeStruct((n, d), jnp.float32),
        grid=(pl.cdiv(n, tm),),
        in_specs=[
            pl.BlockSpec((tm, 1), lambda i: (i, 0)),
            pl.BlockSpec((1, d), lambda i: (0, 0)),    # weights: index_map ignores
            pl.BlockSpec((1, d), lambda i: (0, 0)),    # the row index -> stay
            pl.BlockSpec((d, d), lambda i: (0, 0)),    # resident across M-steps
            pl.BlockSpec((1, d), lambda i: (0, 0)),
        ],
        out_specs=pl.BlockSpec((tm, d), lambda i: (i, 0)),
        compiler_params=pltpu.CompilerParams(dimension_semantics=("parallel",)),
    )(x, w1, b1, w2, b2)


# ----------------------------------------------------------------------------
# Kernel 2: fused bad-transformer block (one pallas_call per block)
# ----------------------------------------------------------------------------
def _block_kernel(deepth, reassociate, x_ref, pos_ref, encw_ref, decw_ref, o_ref):
    # Prologue: position-embedding add fused in (free VPU filler under the MXU).
    y = x_ref[...] + pos_ref[...]                                       # (S, D) f32
    for l in range(deepth):                                             # static unroll
        y = jnp.maximum(_mm(y, encw_ref[l]), 0.0)

    # L2-normalize rows: y / (||y||_2 + 1e-6), f32; reciprocal goes to the EUP slot.
    norm = jnp.sqrt(jnp.sum(y * y, axis=-1, keepdims=True))
    yn = y * pl.reciprocal(norm + 1e-6, approx=True)
    ynm = yn.astype(MXU_DTYPE)

    if reassociate:
        # S > D: yn @ (ynT @ yn) -- (D, D) intermediate, 2*S*D^2 flops.
        gram = lax.dot_general(ynm, ynm, (((0,), (0,)), ((), ())),
                               preferred_element_type=jnp.float32)      # (D, D)
        y = lax.dot_general(ynm, gram.astype(MXU_DTYPE), (((1,), (0,)), ((), ())),
                            preferred_element_type=jnp.float32)         # (S, D)
    else:
        # S <= D: (yn @ ynT) @ yn; contract last dims directly (no explicit .T).
        cmp = lax.dot_general(ynm, ynm, (((1,), (1,)), ((), ())),
                              preferred_element_type=jnp.float32)       # (S, S)
        y = lax.dot_general(cmp.astype(MXU_DTYPE), ynm, (((1,), (0,)), ((), ())),
                            preferred_element_type=jnp.float32)         # (S, D)

    for l in range(deepth):
        y = jnp.maximum(_mm(y, decw_ref[l]), 0.0)
    o_ref[...] = y


def bad_transformer_block(x, pos, enc_w, dec_w):
    """x: (B, S, D); pos: (1, >=S, D); enc_w/dec_w: (deepth, D, D)."""
    b, s, d = x.shape
    deepth = enc_w.shape[0]
    pos_s = pos[:, :s]                     # tiny parameter slice (S*D floats)
    kernel = functools.partial(_block_kernel, deepth, s > d)
    # TODO(synk): for S*D or deepth*D*D too large for VMEM (~64 MiB on v7x),
    # tile the S axis and stream weights with pltpu.emit_pipeline instead of
    # whole-(S, D) blocks.
    return pl.pallas_call(
        kernel,
        out_shape=jax.ShapeDtypeStruct((b, s, d), jnp.float32),
        grid=(b,),
        in_specs=[
            pl.BlockSpec((pl.Squeezed(), s, d), lambda i: (i, 0, 0)),
            pl.BlockSpec((pl.Squeezed(), s, d), lambda i: (0, 0, 0)),
            pl.BlockSpec((deepth, d, d), lambda i: (0, 0, 0)),   # weights resident
            pl.BlockSpec((deepth, d, d), lambda i: (0, 0, 0)),   # across grid steps
        ],
        out_specs=pl.BlockSpec((pl.Squeezed(), s, d), lambda i: (i, 0, 0)),
        compiler_params=pltpu.CompilerParams(
            dimension_semantics=("parallel",),     # batch shards across TCs (v7x)
            vmem_limit_bytes=_VMEM_LIMIT,
        ),
    )(x, pos_s, enc_w, dec_w)


# ----------------------------------------------------------------------------
# Kernel 3: fused windup  (Linear(D,D)+ReLU, Linear(D,1)+ReLU)
# ----------------------------------------------------------------------------
def _windup_kernel(x_ref, w1_ref, b1_ref, w2_ref, b2_ref, o_ref):
    h = jnp.maximum(_mm(x_ref[...], w1_ref[...]) + b1_ref[...], 0.0)    # (tm, D)
    # Dout == 1 layer: lane reduction (VPU/XLU) instead of an N=1 MXU matmul.
    out = jnp.sum(h * w2_ref[...], axis=-1, keepdims=True) + b2_ref[...]
    o_ref[...] = jnp.maximum(out, 0.0)                                  # (tm, 1)


def windup(x, w1, b1, w2, b2):
    """x: (N, D) -> (N, 1).  w2 is stored as a (1, D) row vector."""
    n, d = x.shape
    tm = min(_ROW_TILE, n)
    return pl.pallas_call(
        _windup_kernel,
        out_shape=jax.ShapeDtypeStruct((n, 1), jnp.float32),
        grid=(pl.cdiv(n, tm),),
        in_specs=[
            pl.BlockSpec((tm, d), lambda i: (i, 0)),
            pl.BlockSpec((d, d), lambda i: (0, 0)),
            pl.BlockSpec((1, d), lambda i: (0, 0)),
            pl.BlockSpec((1, d), lambda i: (0, 0)),
            pl.BlockSpec((1, 1), lambda i: (0, 0)),
        ],
        out_specs=pl.BlockSpec((tm, 1), lambda i: (i, 0)),   # final output: only N floats
        compiler_params=pltpu.CompilerParams(dimension_semantics=("parallel",)),
    )(x, w1, b1, w2, b2)


# ----------------------------------------------------------------------------
# Parameters + forward orchestration (all hot compute lives in the 3 kernels)
# ----------------------------------------------------------------------------
def init_params(key, *, max_seq_len, dim, deepth, num_layers):
    ks = iter(jax.random.split(key, 8 + 3 * num_layers))
    scale = 1.0 / jnp.sqrt(jnp.float32(dim))
    params = {
        "pre": {
            "w1": jax.random.normal(next(ks), (1, dim), jnp.float32) * 0.5,
            "b1": jax.random.normal(next(ks), (1, dim), jnp.float32) * 0.1,
            "w2": jax.random.normal(next(ks), (dim, dim), jnp.float32) * scale,
            "b2": jax.random.normal(next(ks), (1, dim), jnp.float32) * 0.1,
        },
        "blocks": [],
        "windup": {
            "w1": jax.random.normal(next(ks), (dim, dim), jnp.float32) * scale,
            "b1": jax.random.normal(next(ks), (1, dim), jnp.float32) * 0.1,
            "w2": jax.random.normal(next(ks), (1, dim), jnp.float32) * scale,   # (1, D) row
            "b2": jax.random.normal(next(ks), (1, 1), jnp.float32) * 0.1,
        },
    }
    for _ in range(num_layers):
        params["blocks"].append({
            "pos": jax.random.normal(next(ks), (1, max_seq_len, dim), jnp.float32),
            "enc": jax.random.normal(next(ks), (deepth, dim, dim), jnp.float32) * scale,
            "dec": jax.random.normal(next(ks), (deepth, dim, dim), jnp.float32) * scale,
        })
    return params


def model_forward(params, x):
    b, s, _ = x.shape
    d = params["pre"]["w1"].shape[1]
    n = b * s
    h = pre_embedding(x.reshape(n, 1), params["pre"]["w1"], params["pre"]["b1"],
                      params["pre"]["w2"], params["pre"]["b2"])
    h = h.reshape(b, s, d)
    for blk in params["blocks"]:
        h = bad_transformer_block(h, blk["pos"], blk["enc"], blk["dec"])
    out = windup(h.reshape(n, d), params["windup"]["w1"], params["windup"]["b1"],
                 params["windup"]["w2"], params["windup"]["b2"])
    return out.reshape(b, s, 1)


def reference_forward(params, x):
    """Pure-JAX reference mirroring the torch graph (same matmul precision policy)."""
    b, s, _ = x.shape
    d = params["pre"]["w1"].shape[1]
    h = jnp.maximum(x.reshape(b * s, 1) * params["pre"]["w1"] + params["pre"]["b1"], 0.0)
    h = jnp.maximum(_mm(h, params["pre"]["w2"]) + params["pre"]["b2"], 0.0)
    y = h.reshape(b, s, d)
    for blk in params["blocks"]:
        y = y + blk["pos"][:, :s]
        for l in range(blk["enc"].shape[0]):
            y = jnp.maximum(_mm(y, blk["enc"][l]), 0.0)
        norm = jnp.sqrt(jnp.sum(y * y, axis=-1, keepdims=True))
        y = y / (norm + 1e-6)
        ym = y.astype(MXU_DTYPE)
        cmp = jnp.einsum("bij,bkj->bik", ym, ym, preferred_element_type=jnp.float32)
        y = jnp.einsum("bik,bkd->bid", cmp.astype(MXU_DTYPE), ym,
                       preferred_element_type=jnp.float32)
        for l in range(blk["dec"].shape[0]):
            y = jnp.maximum(_mm(y, blk["dec"][l]), 0.0)
    h = jnp.maximum(_mm(y.reshape(b * s, d), params["windup"]["w1"])
                    + params["windup"]["b1"], 0.0)
    out = jnp.maximum(
        jnp.sum(h * params["windup"]["w2"], axis=-1, keepdims=True)
        + params["windup"]["b2"], 0.0)
    return out.reshape(b, s, 1)


if __name__ == "__main__":
    B, S, D = 2, 8, 32
    MAX_SEQ, DEEPTH, NUM_LAYERS = 16, 2, 2

    key = jax.random.PRNGKey(0)
    pkey, xkey = jax.random.split(key)
    params = init_params(pkey, max_seq_len=MAX_SEQ, dim=D,
                         deepth=DEEPTH, num_layers=NUM_LAYERS)
    x = jax.random.normal(xkey, (B, S, 1), dtype=jnp.float32)

    fwd = jax.jit(model_forward)
    out = fwd(params, x)
    jax.block_until_ready(out)

    assert out.shape == (B, S, 1)
    assert bool(jnp.all(jnp.isfinite(out)))

    ref = reference_forward(params, x)
    err = float(jnp.max(jnp.abs(out - ref)))
    assert err < 2e-2, f"kernel/reference mismatch: max abs err {err}"
    print("KERNEL_OK")
</pallas_src>

<mosaic_0001>
module attributes {stable_mosaic.version = 11 : i64} {
  func.func @_pre_kernel(%arg0: i32, %arg1: memref<16x1xf32, #tpu.memory_space<vmem>>, %arg2: memref<1x32xf32, #tpu.memory_space<vmem>>, %arg3: memref<1x32xf32, #tpu.memory_space<vmem>>, %arg4: memref<32x32xf32, #tpu.memory_space<vmem>>, %arg5: memref<1x32xf32, #tpu.memory_space<vmem>>, %arg6: memref<16x32xf32, #tpu.memory_space<vmem>>) attributes {dimension_semantics = [#tpu.dimension_semantics<parallel>], iteration_bounds = array<i64: 1>, scalar_prefetch = 0 : i64, scratch_operands = 0 : i64, tpu.core_type = #tpu.core_type<tc>, window_params = [{transform_indices = @transform_0, window_bounds = array<i64: 16, 1>}, {pipeline_mode = #tpu.pipeline_mode<synchronous>, transform_indices = @transform_1, window_bounds = array<i64: 1, 32>}, {pipeline_mode = #tpu.pipeline_mode<synchronous>, transform_indices = @transform_2, window_bounds = array<i64: 1, 32>}, {pipeline_mode = #tpu.pipeline_mode<synchronous>, transform_indices = @transform_3, window_bounds = array<i64: 32, 32>}, {pipeline_mode = #tpu.pipeline_mode<synchronous>, transform_indices = @transform_4, window_bounds = array<i64: 1, 32>}, {transform_indices = @transform_5, window_bounds = array<i64: 16, 32>}]} {
    %c0 = arith.constant 0 : index
    %c0_0 = arith.constant 0 : index
    %0 = vector.load %arg1[%c0, %c0_0] : memref<16x1xf32, #tpu.memory_space<vmem>>, vector<16x1xf32>
    %c0_1 = arith.constant 0 : index
    %c0_2 = arith.constant 0 : index
    %1 = vector.load %arg2[%c0_1, %c0_2] : memref<1x32xf32, #tpu.memory_space<vmem>>, vector<1x32xf32>
    %2 = vector.broadcast %0 : vector<16x1xf32> to vector<16x32xf32>
    %3 = vector.broadcast %1 : vector<1x32xf32> to vector<16x32xf32>
    %4 = arith.mulf %2, %3 : vector<16x32xf32>
    %c0_3 = arith.constant 0 : index
    %c0_4 = arith.constant 0 : index
    %5 = vector.load %arg3[%c0_3, %c0_4] : memref<1x32xf32, #tpu.memory_space<vmem>>, vector<1x32xf32>
    %6 = vector.broadcast %5 : vector<1x32xf32> to vector<16x32xf32>
    %7 = arith.addf %4, %6 : vector<16x32xf32>
    %cst = arith.constant 0.000000e+00 : f32
    %8 = vector.broadcast %cst : f32 to vector<16x32xf32>
    %9 = arith.maximumf %7, %8 : vector<16x32xf32>
    %c0_5 = arith.constant 0 : index
    %c0_6 = arith.constant 0 : index
    %10 = vector.load %arg4[%c0_5, %c0_6] : memref<32x32xf32, #tpu.memory_space<vmem>>, vector<32x32xf32>
    %11 = arith.truncf %9 : vector<16x32xf32> to vector<16x32xbf16>
    %12 = arith.truncf %10 : vector<32x32xf32> to vector<32x32xbf16>
    %cst_7 = arith.constant dense<0.000000e+00> : vector<16x32xf32>
    %13 = tpu.matmul %11, %12, %cst_7 {dimension_numbers = #tpu.dot_dimension_numbers<[1], [0], [0], [1], [0, 0, 1, 1], [], []>} : vector<16x32xbf16>, vector<32x32xbf16>, vector<16x32xf32> -> vector<16x32xf32>
    %c0_8 = arith.constant 0 : index
    %c0_9 = arith.constant 0 : index
    %14 = vector.load %arg5[%c0_8, %c0_9] : memref<1x32xf32, #tpu.memory_space<vmem>>, vector<1x32xf32>
    %15 = vector.broadcast %14 : vector<1x32xf32> to vector<16x32xf32>
    %16 = arith.addf %13, %15 : vector<16x32xf32>
    %cst_10 = arith.constant 0.000000e+00 : f32
    %17 = vector.broadcast %cst_10 : f32 to vector<16x32xf32>
    %18 = arith.maximumf %16, %17 : vector<16x32xf32>
    %c0_11 = arith.constant 0 : index
    %c0_12 = arith.constant 0 : index
    %19 = vector.load %arg6[%c0_11, %c0_12] : memref<16x32xf32, #tpu.memory_space<vmem>>, vector<16x32xf32>
    tpu.vector_store %arg6[%c0_11, %c0_12], %18 {strides = array<i32>} : memref<16x32xf32, #tpu.memory_space<vmem>>, vector<16x32xf32>,
    return
  }
  func.func @transform_0(%arg0: i32) -> (i32, i32) {
    %c0_i32 = arith.constant 0 : i32
    %c0_i32_0 = arith.constant 0 : i32
    return %arg0, %c0_i32 : i32, i32
  }
  func.func @transform_1(%arg0: i32) -> (i32, i32) {
    %c0_i32 = arith.constant 0 : i32
    %c0_i32_0 = arith.constant 0 : i32
    %c0_i32_1 = arith.constant 0 : i32
    return %c0_i32, %c0_i32_0 : i32, i32
  }
  func.func @transform_2(%arg0: i32) -> (i32, i32) {
    %c0_i32 = arith.constant 0 : i32
    %c0_i32_0 = arith.constant 0 : i32
    %c0_i32_1 = arith.constant 0 : i32
    return %c0_i32, %c0_i32_0 : i32, i32
  }
  func.func @transform_3(%arg0: i32) -> (i32, i32) {
    %c0_i32 = arith.constant 0 : i32
    %c0_i32_0 = arith.constant 0 : i32
    %c0_i32_1 = arith.constant 0 : i32
    return %c0_i32, %c0_i32_0 : i32, i32
  }
  func.func @transform_4(%arg0: i32) -> (i32, i32) {
    %c0_i32 = arith.constant 0 : i32
    %c0_i32_0 = arith.constant 0 : i32
    %c0_i32_1 = arith.constant 0 : i32
    return %c0_i32, %c0_i32_0 : i32, i32
  }
  func.func @transform_5(%arg0: i32) -> (i32, i32) {
    %c0_i32 = arith.constant 0 : i32
    %c0_i32_0 = arith.constant 0 : i32
    return %arg0, %c0_i32 : i32, i32
  }
}

module attributes {stable_mosaic.version = 11 : i64} {
  func.func @_windup_kernel(%arg0: i32, %arg1: memref<16x32xf32, #tpu.memory_space<vmem>>, %arg2: memref<32x32xf32, #tpu.memory_space<vmem>>, %arg3: memref<1x32xf32, #tpu.memory_space<vmem>>, %arg4: memref<1x32xf32, #tpu.memory_space<vmem>>, %arg5: memref<1x1xf32, #tpu.memory_space<vmem>>, %arg6: memref<16x1xf32, #tpu.memory_space<vmem>>) attributes {dimension_semantics = [#tpu.dimension_semantics<parallel>], iteration_bounds = array<i64: 1>, scalar_prefetch = 0 : i64, scratch_operands = 0 : i64, tpu.core_type = #tpu.core_type<tc>, window_params = [{transform_indices = @transform_0, window_bounds = array<i64: 16, 32>}, {pipeline_mode = #tpu.pipeline_mode<synchronous>, transform_indices = @transform_1, window_bounds = array<i64: 32, 32>}, {pipeline_mode = #tpu.pipeline_mode<synchronous>, transform_indices = @transform_2, window_bounds = array<i64: 1, 32>}, {pipeline_mode = #tpu.pipeline_mode<synchronous>, transform_indices = @transform_3, window_bounds = array<i64: 1, 32>}, {pipeline_mode = #tpu.pipeline_mode<synchronous>, transform_indices = @transform_4, window_bounds = array<i64: 1, 1>}, {transform_indices = @transform_5, window_bounds = array<i64: 16, 1>}]} {
    %c0 = arith.constant 0 : index
    %c0_0 = arith.constant 0 : index
    %0 = vector.load %arg1[%c0, %c0_0] : memref<16x32xf32, #tpu.memory_space<vmem>>, vector<16x32xf32>
    %c0_1 = arith.constant 0 : index
    %c0_2 = arith.constant 0 : index
    %1 = vector.load %arg2[%c0_1, %c0_2] : memref<32x32xf32, #tpu.memory_space<vmem>>, vector<32x32xf32>
    %2 = arith.truncf %0 : vector<16x32xf32> to vector<16x32xbf16>
    %3 = arith.truncf %1 : vector<32x32xf32> to vector<32x32xbf16>
    %cst = arith.constant dense<0.000000e+00> : vector<16x32xf32>
    %4 = tpu.matmul %2, %3, %cst {dimension_numbers = #tpu.dot_dimension_numbers<[1], [0], [0], [1], [0, 0, 1, 1], [], []>} : vector<16x32xbf16>, vector<32x32xbf16>, vector<16x32xf32> -> vector<16x32xf32>
    %c0_3 = arith.constant 0 : index
    %c0_4 = arith.constant 0 : index
    %5 = vector.load %arg3[%c0_3, %c0_4] : memref<1x32xf32, #tpu.memory_space<vmem>>, vector<1x32xf32>
    %6 = vector.broadcast %5 : vector<1x32xf32> to vector<16x32xf32>
    %7 = arith.addf %4, %6 : vector<16x32xf32>
    %cst_5 = arith.constant 0.000000e+00 : f32
    %8 = vector.broadcast %cst_5 : f32 to vector<16x32xf32>
    %9 = arith.maximumf %7, %8 : vector<16x32xf32>
    %c0_6 = arith.constant 0 : index
    %c0_7 = arith.constant 0 : index
    %10 = vector.load %arg4[%c0_6, %c0_7] : memref<1x32xf32, #tpu.memory_space<vmem>>, vector<1x32xf32>
    %11 = vector.broadcast %10 : vector<1x32xf32> to vector<16x32xf32>
    %12 = arith.mulf %9, %11 : vector<16x32xf32>
    %cst_8 = arith.constant dense<0.000000e+00> : vector<16xf32>
    %13 = vector.multi_reduction <add>, %12, %cst_8 [1] : vector<16x32xf32> to vector<16xf32>
    %14 = vector.shape_cast %13 : vector<16xf32> to vector<16x1xf32>
    %c0_9 = arith.constant 0 : index
    %c0_10 = arith.constant 0 : index
    %15 = vector.load %arg5[%c0_9, %c0_10] : memref<1x1xf32, #tpu.memory_space<vmem>>, vector<1x1xf32>
    %16 = vector.broadcast %15 : vector<1x1xf32> to vector<16x1xf32>
    %17 = arith.addf %14, %16 : vector<16x1xf32>
    %cst_11 = arith.constant 0.000000e+00 : f32
    %18 = vector.broadcast %cst_11 : f32 to vector<16x1xf32>
    %19 = arith.maximumf %17, %18 : vector<16x1xf32>
    %c0_12 = arith.constant 0 : index
    %c0_13 = arith.constant 0 : index
    %20 = vector.load %arg6[%c0_12, %c0_13] : memref<16x1xf32, #tpu.memory_space<vmem>>, vector<16x1xf32>
    tpu.vector_store %arg6[%c0_12, %c0_13], %19 {strides = array<i32>} : memref<16x1xf32, #tpu.memory_space<vmem>>, vector<16x1xf32>,
    return
  }
  func.func @transform_0(%arg0: i32) -> (i32, i32) {
    %c0_i32 = arith.constant 0 : i32
    %c0_i32_0 = arith.constant 0 : i32
    return %arg0, %c0_i32 : i32, i32
  }
  func.func @transform_1(%arg0: i32) -> (i32, i32) {
    %c0_i32 = arith.constant 0 : i32
    %c0_i32_0 = arith.constant 0 : i32
    %c0_i32_1 = arith.constant 0 : i32
    return %c0_i32, %c0_i32_0 : i32, i32
  }
  func.func @transform_2(%arg0: i32) -> (i32, i32) {
    %c0_i32 = arith.constant 0 : i32
    %c0_i32_0 = arith.constant 0 : i32
    %c0_i32_1 = arith.constant 0 : i32
    return %c0_i32, %c0_i32_0 : i32, i32
  }
  func.func @transform_3(%arg0: i32) -> (i32, i32) {
    %c0_i32 = arith.constant 0 : i32
    %c0_i32_0 = arith.constant 0 : i32
    %c0_i32_1 = arith.constant 0 : i32
    return %c0_i32, %c0_i32_0 : i32, i32
  }
  func.func @transform_4(%arg0: i32) -> (i32, i32) {
    %c0_i32 = arith.constant 0 : i32
    %c0_i32_0 = arith.constant 0 : i32
    %c0_i32_1 = arith.constant 0 : i32
    return %c0_i32, %c0_i32_0 : i32, i32
  }
  func.func @transform_5(%arg0: i32) -> (i32, i32) {
    %c0_i32 = arith.constant 0 : i32
    %c0_i32_0 = arith.constant 0 : i32
    return %arg0, %c0_i32 : i32, i32
  }
}

module attributes {stable_mosaic.version = 11 : i64} {
  func.func @_block_kernel(%arg0: i32, %arg1: memref<1x8x32xf32, #tpu.memory_space<vmem>>, %arg2: memref<1x8x32xf32, #tpu.memory_space<vmem>>, %arg3: memref<2x32x32xf32, #tpu.memory_space<vmem>>, %arg4: memref<2x32x32xf32, #tpu.memory_space<vmem>>, %arg5: memref<1x8x32xf32, #tpu.memory_space<vmem>>) attributes {dimension_semantics = [#tpu.dimension_semantics<parallel>], iteration_bounds = array<i64: 2>, scalar_prefetch = 0 : i64, scratch_operands = 0 : i64, tpu.core_type = #tpu.core_type<tc>, window_params = [{transform_indices = @transform_0, window_bounds = array<i64: 1, 8, 32>}, {pipeline_mode = #tpu.pipeline_mode<synchronous>, transform_indices = @transform_1, window_bounds = array<i64: 1, 8, 32>}, {pipeline_mode = #tpu.pipeline_mode<synchronous>, transform_indices = @transform_2, window_bounds = array<i64: 2, 32, 32>}, {pipeline_mode = #tpu.pipeline_mode<synchronous>, transform_indices = @transform_3, window_bounds = array<i64: 2, 32, 32>}, {transform_indices = @transform_4, window_bounds = array<i64: 1, 8, 32>}]} {
    %c0 = arith.constant 0 : index
    %c0_0 = arith.constant 0 : index
    %c0_1 = arith.constant 0 : index
    %0 = vector.load %arg1[%c0, %c0_0, %c0_1] : memref<1x8x32xf32, #tpu.memory_space<vmem>>, vector<1x8x32xf32>
    %1 = vector.shape_cast %0 : vector<1x8x32xf32> to vector<8x32xf32>
    %c0_2 = arith.constant 0 : index
    %c0_3 = arith.constant 0 : index
    %c0_4 = arith.constant 0 : index
    %2 = vector.load %arg2[%c0_2, %c0_3, %c0_4] : memref<1x8x32xf32, #tpu.memory_space<vmem>>, vector<1x8x32xf32>
    %3 = vector.shape_cast %2 : vector<1x8x32xf32> to vector<8x32xf32>
    %4 = arith.addf %1, %3 : vector<8x32xf32>
    %c0_5 = arith.constant 0 : index
    %c0_6 = arith.constant 0 : index
    %c0_7 = arith.constant 0 : index
    %5 = vector.load %arg3[%c0_5, %c0_6, %c0_7] : memref<2x32x32xf32, #tpu.memory_space<vmem>>, vector<1x32x32xf32>
    %6 = vector.shape_cast %5 : vector<1x32x32xf32> to vector<32x32xf32>
    %7 = arith.truncf %4 : vector<8x32xf32> to vector<8x32xbf16>
    %8 = arith.truncf %6 : vector<32x32xf32> to vector<32x32xbf16>
    %cst = arith.constant dense<0.000000e+00> : vector<8x32xf32>
    %9 = tpu.matmul %7, %8, %cst {dimension_numbers = #tpu.dot_dimension_numbers<[1], [0], [0], [1], [0, 0, 1, 1], [], []>} : vector<8x32xbf16>, vector<32x32xbf16>, vector<8x32xf32> -> vector<8x32xf32>
    %cst_8 = arith.constant 0.000000e+00 : f32
    %10 = vector.broadcast %cst_8 : f32 to vector<8x32xf32>
    %11 = arith.maximumf %9, %10 : vector<8x32xf32>
    %c1 = arith.constant 1 : index
    %c0_9 = arith.constant 0 : index
    %c0_10 = arith.constant 0 : index
    %12 = vector.load %arg3[%c1, %c0_9, %c0_10] : memref<2x32x32xf32, #tpu.memory_space<vmem>>, vector<1x32x32xf32>
    %13 = vector.shape_cast %12 : vector<1x32x32xf32> to vector<32x32xf32>
    %14 = arith.truncf %11 : vector<8x32xf32> to vector<8x32xbf16>
    %15 = arith.truncf %13 : vector<32x32xf32> to vector<32x32xbf16>
    %cst_11 = arith.constant dense<0.000000e+00> : vector<8x32xf32>
    %16 = tpu.matmul %14, %15, %cst_11 {dimension_numbers = #tpu.dot_dimension_numbers<[1], [0], [0], [1], [0, 0, 1, 1], [], []>} : vector<8x32xbf16>, vector<32x32xbf16>, vector<8x32xf32> -> vector<8x32xf32>
    %cst_12 = arith.constant 0.000000e+00 : f32
    %17 = vector.broadcast %cst_12 : f32 to vector<8x32xf32>
    %18 = arith.maximumf %16, %17 : vector<8x32xf32>
    %19 = arith.mulf %18, %18 : vector<8x32xf32>
    %cst_13 = arith.constant dense<0.000000e+00> : vector<8xf32>
    %20 = vector.multi_reduction <add>, %19, %cst_13 [1] : vector<8x32xf32> to vector<8xf32>
    %21 = vector.shape_cast %20 : vector<8xf32> to vector<8x1xf32>
    %22 = math.sqrt %21 : vector<8x1xf32>
    %cst_14 = arith.constant 9.99999997E-7 : f32
    %23 = vector.broadcast %cst_14 : f32 to vector<8x1xf32>
    %24 = arith.addf %22, %23 : vector<8x1xf32>
    %25 = tpu.reciprocal %24 {approx = true} : vector<8x1xf32> -> vector<8x1xf32>
    %26 = vector.broadcast %25 : vector<8x1xf32> to vector<8x32xf32>
    %27 = arith.mulf %18, %26 : vector<8x32xf32>
    %28 = arith.truncf %27 : vector<8x32xf32> to vector<8x32xbf16>
    %cst_15 = arith.constant dense<0.000000e+00> : vector<8x8xf32>
    %29 = tpu.matmul %28, %28, %cst_15 {dimension_numbers = #tpu.dot_dimension_numbers<[1], [1], [0], [0], [0, 0, 1, 0], [], []>} : vector<8x32xbf16>, vector<8x32xbf16>, vector<8x8xf32> -> vector<8x8xf32>
    %30 = arith.truncf %29 : vector<8x8xf32> to vector<8x8xbf16>
    %cst_16 = arith.constant dense<0.000000e+00> : vector<8x32xf32>
    %31 = tpu.matmul %30, %28, %cst_16 {dimension_numbers = #tpu.dot_dimension_numbers<[1], [0], [0], [1], [0, 0, 1, 1], [], []>} : vector<8x8xbf16>, vector<8x32xbf16>, vector<8x32xf32> -> vector<8x32xf32>
    %c0_17 = arith.constant 0 : index
    %c0_18 = arith.constant 0 : index
    %c0_19 = arith.constant 0 : index
    %32 = vector.load %arg4[%c0_17, %c0_18, %c0_19] : memref<2x32x32xf32, #tpu.memory_space<vmem>>, vector<1x32x32xf32>
    %33 = vector.shape_cast %32 : vector<1x32x32xf32> to vector<32x32xf32>
    %34 = arith.truncf %31 : vector<8x32xf32> to vector<8x32xbf16>
    %35 = arith.truncf %33 : vector<32x32xf32> to vector<32x32xbf16>
    %cst_20 = arith.constant dense<0.000000e+00> : vector<8x32xf32>
    %36 = tpu.matmul %34, %35, %cst_20 {dimension_numbers = #tpu.dot_dimension_numbers<[1], [0], [0], [1], [0, 0, 1, 1], [], []>} : vector<8x32xbf16>, vector<32x32xbf16>, vector<8x32xf32> -> vector<8x32xf32>
    %cst_21 = arith.constant 0.000000e+00 : f32
    %37 = vector.broadcast %cst_21 : f32 to vector<8x32xf32>
    %38 = arith.maximumf %36, %37 : vector<8x32xf32>
    %c1_22 = arith.constant 1 : index
    %c0_23 = arith.constant 0 : index
    %c0_24 = arith.constant 0 : index
    %39 = vector.load %arg4[%c1_22, %c0_23, %c0_24] : memref<2x32x32xf32, #tpu.memory_space<vmem>>, vector<1x32x32xf32>
    %40 = vector.shape_cast %39 : vector<1x32x32xf32> to vector<32x32xf32>
    %41 = arith.truncf %38 : vector<8x32xf32> to vector<8x32xbf16>
    %42 = arith.truncf %40 : vector<32x32xf32> to vector<32x32xbf16>
    %cst_25 = arith.constant dense<0.000000e+00> : vector<8x32xf32>
    %43 = tpu.matmul %41, %42, %cst_25 {dimension_numbers = #tpu.dot_dimension_numbers<[1], [0], [0], [1], [0, 0, 1, 1], [], []>} : vector<8x32xbf16>, vector<32x32xbf16>, vector<8x32xf32> -> vector<8x32xf32>
    %cst_26 = arith.constant 0.000000e+00 : f32
    %44 = vector.broadcast %cst_26 : f32 to vector<8x32xf32>
    %45 = arith.maximumf %43, %44 : vector<8x32xf32>
    %c0_27 = arith.constant 0 : index
    %c0_28 = arith.constant 0 : index
    %c0_29 = arith.constant 0 : index
    %46 = vector.load %arg5[%c0_27, %c0_28, %c0_29] : memref<1x8x32xf32, #tpu.memory_space<vmem>>, vector<1x8x32xf32>
    %47 = vector.shape_cast %46 : vector<1x8x32xf32> to vector<8x32xf32>
    %48 = vector.shape_cast %45 : vector<8x32xf32> to vector<1x8x32xf32>
    tpu.vector_store %arg5[%c0_27, %c0_28, %c0_29], %48 {strides = array<i32>} : memref<1x8x32xf32, #tpu.memory_space<vmem>>, vector<1x8x32xf32>,
    return
  }
  func.func @transform_0(%arg0: i32) -> (i32, i32, i32) {
    %c0_i32 = arith.constant 0 : i32
    %c0_i32_0 = arith.constant 0 : i32
    %c0_i32_1 = arith.constant 0 : i32
    return %arg0, %c0_i32, %c0_i32_0 : i32, i32, i32
  }
  func.func @transform_1(%arg0: i32) -> (i32, i32, i32) {
    %c0_i32 = arith.constant 0 : i32
    %c0_i32_0 = arith.constant 0 : i32
    %c0_i32_1 = arith.constant 0 : i32
    %c0_i32_2 = arith.constant 0 : i32
    return %c0_i32, %c0_i32_0, %c0_i32_1 : i32, i32, i32
  }
  func.func @transform_2(%arg0: i32) -> (i32, i32, i32) {
    %c0_i32 = arith.constant 0 : i32
    %c0_i32_0 = arith.constant 0 : i32
    %c0_i32_1 = arith.constant 0 : i32
    %c0_i32_2 = arith.constant 0 : i32
    return %c0_i32, %c0_i32_0, %c0_i32_1 : i32, i32, i32
  }
  func.func @transform_3(%arg0: i32) -> (i32, i32, i32) {
    %c0_i32 = arith.constant 0 : i32
    %c0_i32_0 = arith.constant 0 : i32
    %c0_i32_1 = arith.constant 0 : i32
    %c0_i32_2 = arith.constant 0 : i32
    return %c0_i32, %c0_i32_0, %c0_i32_1 : i32, i32, i32
  }
  func.func @transform_4(%arg0: i32) -> (i32, i32, i32) {
    %c0_i32 = arith.constant 0 : i32
    %c0_i32_0 = arith.constant 0 : i32
    %c0_i32_1 = arith.constant 0 : i32
    return %arg0, %c0_i32, %c0_i32_0 : i32, i32, i32
  }
}

module attributes {stable_mosaic.version = 11 : i64} {
  func.func @_block_kernel(%arg0: i32, %arg1: memref<1x8x32xf32, #tpu.memory_space<vmem>>, %arg2: memref<1x8x32xf32, #tpu.memory_space<vmem>>, %arg3: memref<2x32x32xf32, #tpu.memory_space<vmem>>, %arg4: memref<2x32x32xf32, #tpu.memory_space<vmem>>, %arg5: memref<1x8x32xf32, #tpu.memory_space<vmem>>) attributes {dimension_semantics = [#tpu.dimension_semantics<parallel>], iteration_bounds = array<i64: 2>, scalar_prefetch = 0 : i64, scratch_operands = 0 : i64, tpu.core_type = #tpu.core_type<tc>, window_params = [{transform_indices = @transform_0, window_bounds = array<i64: 1, 8, 32>}, {pipeline_mode = #tpu.pipeline_mode<synchronous>, transform_indices = @transform_1, window_bounds = array<i64: 1, 8, 32>}, {pipeline_mode = #tpu.pipeline_mode<synchronous>, transform_indices = @transform_2, window_bounds = array<i64: 2, 32, 32>}, {pipeline_mode = #tpu.pipeline_mode<synchronous>, transform_indices = @transform_3, window_bounds = array<i64: 2, 32, 32>}, {transform_indices = @transform_4, window_bounds = array<i64: 1, 8, 32>}]} {
    %c0 = arith.constant 0 : index
    %c0_0 = arith.constant 0 : index
    %c0_1 = arith.constant 0 : index
    %0 = vector.load %arg1[%c0, %c0_0, %c0_1] : memref<1x8x32xf32, #tpu.memory_space<vmem>>, vector<1x8x32xf32>
    %1 = vector.shape_cast %0 : vector<1x8x32xf32> to vector<8x32xf32>
    %c0_2 = arith.constant 0 : index
    %c0_3 = arith.constant 0 : index
    %c0_4 = arith.constant 0 : index
    %2 = vector.load %arg2[%c0_2, %c0_3, %c0_4] : memref<1x8x32xf32, #tpu.memory_space<vmem>>, vector<1x8x32xf32>
    %3 = vector.shape_cast %2 : vector<1x8x32xf32> to vector<8x32xf32>
    %4 = arith.addf %1, %3 : vector<8x32xf32>
    %c0_5 = arith.constant 0 : index
    %c0_6 = arith.constant 0 : index
    %c0_7 = arith.constant 0 : index
    %5 = vector.load %arg3[%c0_5, %c0_6, %c0_7] : memref<2x32x32xf32, #tpu.memory_space<vmem>>, vector<1x32x32xf32>
    %6 = vector.shape_cast %5 : vector<1x32x32xf32> to vector<32x32xf32>
    %7 = arith.truncf %4 : vector<8x32xf32> to vector<8x32xbf16>
    %8 = arith.truncf %6 : vector<32x32xf32> to vector<32x32xbf16>
    %cst = arith.constant dense<0.000000e+00> : vector<8x32xf32>
    %9 = tpu.matmul %7, %8, %cst {dimension_numbers = #tpu.dot_dimension_numbers<[1], [0], [0], [1], [0, 0, 1, 1], [], []>} : vector<8x32xbf16>, vector<32x32xbf16>, vector<8x32xf32> -> vector<8x32xf32>
    %cst_8 = arith.constant 0.000000e+00 : f32
    %10 = vector.broadcast %cst_8 : f32 to vector<8x32xf32>
    %11 = arith.maximumf %9, %10 : vector<8x32xf32>
    %c1 = arith.constant 1 : index
    %c0_9 = arith.constant 0 : index
    %c0_10 = arith.constant 0 : index
    %12 = vector.load %arg3[%c1, %c0_9, %c0_10] : memref<2x32x32xf32, #tpu.memory_space<vmem>>, vector<1x32x32xf32>
    %13 = vector.shape_cast %12 : vector<1x32x32xf32> to vector<32x32xf32>
    %14 = arith.truncf %11 : vector<8x32xf32> to vector<8x32xbf16>
    %15 = arith.truncf %13 : vector<32x32xf32> to vector<32x32xbf16>
    %cst_11 = arith.constant dense<0.000000e+00> : vector<8x32xf32>
    %16 = tpu.matmul %14, %15, %cst_11 {dimension_numbers = #tpu.dot_dimension_numbers<[1], [0], [0], [1], [0, 0, 1, 1], [], []>} : vector<8x32xbf16>, vector<32x32xbf16>, vector<8x32xf32> -> vector<8x32xf32>
    %cst_12 = arith.constant 0.000000e+00 : f32
    %17 = vector.broadcast %cst_12 : f32 to vector<8x32xf32>
    %18 = arith.maximumf %16, %17 : vector<8x32xf32>
    %19 = arith.mulf %18, %18 : vector<8x32xf32>
    %cst_13 = arith.constant dense<0.000000e+00> : vector<8xf32>
    %20 = vector.multi_reduction <add>, %19, %cst_13 [1] : vector<8x32xf32> to vector<8xf32>
    %21 = vector.shape_cast %20 : vector<8xf32> to vector<8x1xf32>
    %22 = math.sqrt %21 : vector<8x1xf32>
    %cst_14 = arith.constant 9.99999997E-7 : f32
    %23 = vector.broadcast %cst_14 : f32 to vector<8x1xf32>
    %24 = arith.addf %22, %23 : vector<8x1xf32>
    %25 = tpu.reciprocal %24 {approx = true} : vector<8x1xf32> -> vector<8x1xf32>
    %26 = vector.broadcast %25 : vector<8x1xf32> to vector<8x32xf32>
    %27 = arith.mulf %18, %26 : vector<8x32xf32>
    %28 = arith.truncf %27 : vector<8x32xf32> to vector<8x32xbf16>
    %cst_15 = arith.constant dense<0.000000e+00> : vector<8x8xf32>
    %29 = tpu.matmul %28, %28, %cst_15 {dimension_numbers = #tpu.dot_dimension_numbers<[1], [1], [0], [0], [0, 0, 1, 0], [], []>} : vector<8x32xbf16>, vector<8x32xbf16>, vector<8x8xf32> -> vector<8x8xf32>
    %30 = arith.truncf %29 : vector<8x8xf32> to vector<8x8xbf16>
    %cst_16 = arith.constant dense<0.000000e+00> : vector<8x32xf32>
    %31 = tpu.matmul %30, %28, %cst_16 {dimension_numbers = #tpu.dot_dimension_numbers<[1], [0], [0], [1], [0, 0, 1, 1], [], []>} : vector<8x8xbf16>, vector<8x32xbf16>, vector<8x32xf32> -> vector<8x32xf32>
    %c0_17 = arith.constant 0 : index
    %c0_18 = arith.constant 0 : index
    %c0_19 = arith.constant 0 : index
    %32 = vector.load %arg4[%c0_17, %c0_18, %c0_19] : memref<2x32x32xf32, #tpu.memory_space<vmem>>, vector<1x32x32xf32>
    %33 = vector.shape_cast %32 : vector<1x32x32xf32> to vector<32x32xf32>
    %34 = arith.truncf %31 : vector<8x32xf32> to vector<8x32xbf16>
    %35 = arith.truncf %33 : vector<32x32xf32> to vector<32x32xbf16>
    %cst_20 = arith.constant dense<0.000000e+00> : vector<8x32xf32>
    %36 = tpu.matmul %34, %35, %cst_20 {dimension_numbers = #tpu.dot_dimension_numbers<[1], [0], [0], [1], [0, 0, 1, 1], [], []>} : vector<8x32xbf16>, vector<32x32xbf16>, vector<8x32xf32> -> vector<8x32xf32>
    %cst_21 = arith.constant 0.000000e+00 : f32
    %37 = vector.broadcast %cst_21 : f32 to vector<8x32xf32>
    %38 = arith.maximumf %36, %37 : vector<8x32xf32>
    %c1_22 = arith.constant 1 : index
    %c0_23 = arith.constant 0 : index
    %c0_24 = arith.constant 0 : index
    %39 = vector.load %arg4[%c1_22, %c0_23, %c0_24] : memref<2x32x32xf32, #tpu.memory_space<vmem>>, vector<1x32x32xf32>
    %40 = vector.shape_cast %39 : vector<1x32x32xf32> to vector<32x32xf32>
    %41 = arith.truncf %38 : vector<8x32xf32> to vector<8x32xbf16>
    %42 = arith.truncf %40 : vector<32x32xf32> to vector<32x32xbf16>
    %cst_25 = arith.constant dense<0.000000e+00> : vector<8x32xf32>
    %43 = tpu.matmul %41, %42, %cst_25 {dimension_numbers = #tpu.dot_dimension_numbers<[1], [0], [0], [1], [0, 0, 1, 1], [], []>} : vector<8x32xbf16>, vector<32x32xbf16>, vector<8x32xf32> -> vector<8x32xf32>
    %cst_26 = arith.constant 0.000000e+00 : f32
    %44 = vector.broadcast %cst_26 : f32 to vector<8x32xf32>
    %45 = arith.maximumf %43, %44 : vector<8x32xf32>
    %c0_27 = arith.constant 0 : index
    %c0_28 = arith.constant 0 : index
    %c0_29 = arith.constant 0 : index
    %46 = vector.load %arg5[%c0_27, %c0_28, %c0_29] : memref<1x8x32xf32, #tpu.memory_space<vmem>>, vector<1x8x32xf32>
    %47 = vector.shape_cast %46 : vector<1x8x32xf32> to vector<8x32xf32>
    %48 = vector.shape_cast %45 : vector<8x32xf32> to vector<1x8x32xf32>
    tpu.vector_store %arg5[%c0_27, %c0_28, %c0_29], %48 {strides = array<i32>} : memref<1x8x32xf32, #tpu.memory_space<vmem>>, vector<1x8x32xf32>,
    return
  }
  func.func @transform_0(%arg0: i32) -> (i32, i32, i32) {
    %c0_i32 = arith.constant 0 : i32
    %c0_i32_0 = arith.constant 0 : i32
    %c0_i32_1 = arith.constant 0 : i32
    return %arg0, %c0_i32, %c0_i32_0 : i32, i32, i32
  }
  func.func @transform_1(%arg0: i32) -> (i32, i32, i32) {
    %c0_i32 = arith.constant 0 : i32
    %c0_i32_0 = arith.constant 0 : i32
    %c0_i32_1 = arith.constant 0 : i32
    %c0_i32_2 = arith.constant 0 : i32
    return %c0_i32, %c0_i32_0, %c0_i32_1 : i32, i32, i32
  }
  func.func @transform_2(%arg0: i32) -> (i32, i32, i32) {
    %c0_i32 = arith.constant 0 : i32
    %c0_i32_0 = arith.constant 0 : i32
    %c0_i32_1 = arith.constant 0 : i32
    %c0_i32_2 = arith.constant 0 : i32
    return %c0_i32, %c0_i32_0, %c0_i32_1 : i32, i32, i32
  }
  func.func @transform_3(%arg0: i32) -> (i32, i32, i32) {
    %c0_i32 = arith.constant 0 : i32
    %c0_i32_0 = arith.constant 0 : i32
    %c0_i32_1 = arith.constant 0 : i32
    %c0_i32_2 = arith.constant 0 : i32
    return %c0_i32, %c0_i32_0, %c0_i32_1 : i32, i32, i32
  }
  func.func @transform_4(%arg0: i32) -> (i32, i32, i32) {
    %c0_i32 = arith.constant 0 : i32
    %c0_i32_0 = arith.constant 0 : i32
    %c0_i32_1 = arith.constant 0 : i32
    return %arg0, %c0_i32, %c0_i32_0 : i32, i32, i32
  }
}

</mosaic_0001>

<bundles_post_ra>
// kernel: model_forward.4
= control target key start
LH: loop header
LB: loop body
LE: loop exit
PB: predicated region body
PF: predicated region fallthrough
CT: control target
= control target key end

     0   :  { %v139_v0 = vmov 0   ;;  %v140_v2 = vmov 0.0   ;;  %vm141_vm0 = vmmov 0   ;;  %vm67_vm1 = vcmask 261120   ;;  %s205_s0 = inlined_call_operand.vmem [shape: f32[16,1], index: 0, kind: input, shape index: {}]   ;;  %s206_s3 = inlined_call_operand.vmem [shape: f32[32,32], index: 3, kind: input, shape index: {}]   ;;  %s207_s1 = inlined_call_operand.vmem [shape: f32[1,32], index: 1, kind: input, shape index: {}]   ;;  %s208_s2 = inlined_call_operand.vmem [shape: f32[1,32], index: 2, kind: input, shape index: {}]   ;;  %s209_s4 = inlined_call_operand.vmem [shape: f32[1,32], index: 4, kind: input, shape index: {}]   ;;  %s210_s5 = inlined_call_operand.vmem [shape: f32[16,32], index: 5, kind: output, shape index: {}]  }
   0x1   :  { %138 = vset.pattern.permute.xlu0 %v139_v0  ;;  %v21_v1 = vld [vmem:[%s205_s0] sm:$0xff]  ;;  %127 = vmatprep.subr.bf16.mxu0 %v140_v2  ;;  %v55_v3 = vld [vmem:[%s206_s3 + $0x10] sm:$0xff]  ;;  %v56_v4 = vld [vmem:[%s206_s3 + $0x18] sm:$0xff] }
   0x2   :  { %26 = vperm.xlu0 %138, %v21_v1   ;;  %v22_v5 = vld [vmem:[%s205_s0 + $0x8] sm:$0xff]  ;;  %v59_v6 = vpack.c.bf16 %v56_v4, %v55_v3  ;;  %v53_v7 = vld [vmem:[%s206_s3] sm:$0xff]  ;;  %131 = vmatprep.mubr.msk.bf16.mxu0 %vm141_vm0, %v140_v2 }
   0x3   :  { %v54_v8 = vld [vmem:[%s206_s3 + $0x8] sm:$0xff]  ;;  %v120_v10 = vld [vmem:[%s207_s1] ss:$0 sm:$0xff] }
   0x4   :  { %128 = vmatpush3.bf16.msra.mxu0 %v59_v6  ;;  %v58_v9 = vpack.c.bf16 %v54_v8, %v53_v7  ;;  %v121_v13 = vld [vmem:[%s208_s2] ss:$0 sm:$0xff] }
   0x5   :  { %129 = vmatprep.subr.bf16.mxu0 %v140_v2  ;;  %v122_v21 = vld [vmem:[%s209_s4] ss:$0 sm:$0xff] }
   0x6   :  { %31 = vperm.xlu0 %138, %v22_v5  }
   0x8   :  { %130 = vmatpush3.bf16.msra.mxu0 %v58_v9 }
  0x7d   :  { %v27_v11 = vpop.permute.xlu0 %26 }
  0x7e   :  { %v40_v12 = vmul.f32 %v120_v10, %v27_v11 }
  0x80   :  { %v49_v15 = vadd.f32 %v121_v13, %v40_v12 }
  0x81   :  { %v32_v14 = vpop.permute.xlu0 %31 }
  0x82   :  { %v41_v16 = vmul.f32 %v120_v10, %v32_v14  ;;  %v51_v18 = vmax.f32 %v49_v15, 0.0 }
  0x84   :  { %v50_v17 = vadd.f32 %v121_v13, %v41_v16 }
  0x86   :  { %v52_v19 = vmax.f32 %v50_v17, 0.0 }
  0x88   :  { %v57_v20 = vpack.c.bf16 %v52_v19, %v51_v18 }
  0x8a   :  { %132 = vmatmul.mubr.msk.bf16.vlgmr.msra.gmra.mxu0 %vm67_vm1, %v57_v20 }
 0x14a   :  { %v105_v22 = vpop.f32.mrf.mxu0 }
 0x14b   :  { %v106_v23 = vadd.f32 %v122_v21, %v105_v22 }
 0x14c   :  { %v133_v24 = vpop.f32.mrf.mxu0 }
 0x14d   :  { %v112_v25 = vmax.f32 %v106_v23, 0.0 }
 0x14e   :  { %v108_v26 = vpop.f32.mrf.mxu0 }
 0x14f   :  { %114 = vst.msk [vmem:[%s210_s5] sm:$0xff] %vm67_vm1, %v112_v25  ;;  %v109_v27 = vadd.f32 %v122_v21, %v108_v26 }
 0x150   :  { %v134_v28 = vpop.f32.mrf.mxu0 }
 0x151   :  { %v113_v29 = vmax.f32 %v109_v27, 0.0 }
 0x153   :  { %115 = vst.msk [vmem:[%s210_s5 + $0x8] sm:$0xff] %vm67_vm1, %v113_v29 }

// kernel: model_forward.7
= control target key start
LH: loop header
LB: loop body
LE: loop exit
PB: predicated region body
PF: predicated region fallthrough
CT: control target
= control target key end

     0   :  { %v136_v0 = vmov 0.0   ;;  %vm137_vm0 = vmmov 0   ;;  %vm39_vm1 = vcmask 261120   ;;  %vm112_vm2 = vcmask 7168   ;;  %s204_s1 = inlined_call_operand.vmem [shape: f32[32,32], index: 1, kind: input, shape index: {}]   ;;  %s205_s0 = inlined_call_operand.vmem [shape: f32[16,32], index: 0, kind: input, shape index: {}]   ;;  %s206_s4 = inlined_call_operand.<no memory space> [shape: f32[1,1], index: 4, kind: input, shape index: {}]   ;;  %s207_s2 = inlined_call_operand.vmem [shape: f32[1,32], index: 2, kind: input, shape index: {}]   ;;  %s208_s3 = inlined_call_operand.vmem [shape: f32[1,32], index: 3, kind: input, shape index: {}]   ;;  %s209_s5 = inlined_call_operand.vmem [shape: f32[16,1], index: 5, kind: output, shape index: {}]  }
   0x1   :  { %126 = vmatprep.subr.bf16.mxu0 %v136_v0  ;;  %v27_v1 = vld [vmem:[%s204_s1 + $0x10] sm:$0xff]  ;;  %v28_v2 = vld [vmem:[%s204_s1 + $0x18] sm:$0xff]  ;;  %v25_v3 = vld [vmem:[%s204_s1] sm:$0xff]  ;;  %130 = vmatprep.mubr.msk.bf16.mxu0 %vm137_vm0, %v136_v0  ;;  %v10_v10 = vstv %s206_s4 }
   0x2   :  { %v31_v4 = vpack.c.bf16 %v28_v2, %v27_v1  ;;  %v26_v5 = vld [vmem:[%s204_s1 + $0x8] sm:$0xff]  ;;  %v23_v7 = vld [vmem:[%s205_s0] sm:$0xff]  ;;  %11 = vst [vmem:[#allocation2] sm:$0x1] %v10_v10 }
   0x3   :  { %v30_v6 = vpack.c.bf16 %v26_v5, %v25_v3  ;;  %v24_v8 = vld [vmem:[%s205_s0 + $0x8] sm:$0xff]  ;;  %v119_v11 = vld [vmem:[%s207_s2] ss:$0 sm:$0xff] }
   0x4   :  { %127 = vmatpush3.bf16.msra.mxu0 %v31_v4  ;;  %v29_v9 = vpack.c.bf16 %v24_v8, %v23_v7  ;;  %v121_v15 = vld [vmem:[%s208_s3] ss:$0 sm:$0xff] }
   0x5   :  { %128 = vmatprep.subr.bf16.mxu0 %v136_v0 }
   0x8   :  { %129 = vmatpush3.bf16.msra.mxu0 %v30_v6 }
   0x9   :  { %v122_v25 = vld [vmem:[#allocation2] ss:$0 sm:$0xff] }
   0xb   :  { %131 = vmatmul.mubr.msk.bf16.vlgmr.msra.gmra.mxu0 %vm39_vm1, %v29_v9 }
  0xcb   :  { %v77_v12 = vpop.f32.mrf.mxu0 }
  0xcc   :  { %v78_v13 = vadd.f32 %v119_v11, %v77_v12 }
  0xcd   :  { %v132_v14 = vpop.f32.mrf.mxu0 }
  0xce   :  { %v84_v16 = vmax.f32 %v78_v13, 0.0 }
  0xcf   :  { %v80_v17 = vpop.f32.mrf.mxu0 }
  0xd0   :  { %v81_v18 = vadd.f32 %v119_v11, %v80_v17  ;;  %v93_v19 = vmul.f32 %v121_v15, %v84_v16 }
  0xd1   :  { %v133_v20 = vpop.f32.mrf.mxu0 }
  0xd2   :  { %v85_v21 = vmax.f32 %v81_v18, 0.0  ;;  %v95_v22 = vsel %vm39_vm1, %v93_v19, 0.0 }
  0xd3   :  { %96 = vadd.xlane.f32.xlu0 %v95_v22 }
  0xd4   :  { %v94_v23 = vmul.f32 %v121_v15, %v85_v21 }
  0xd6   :  { %v98_v24 = vsel %vm39_vm1, %v94_v23, 0.0 }
  0xd7   :  { %99 = vadd.xlane.f32.xlu0 %v98_v24 }
 0x15c   :  { %v97_v26 = vpop.xlane.xlu0 %96 }
 0x15d   :  { %v108_v27 = vadd.f32 %v122_v25, %v97_v26 }
 0x15f   :  { %v110_v28 = vmax.f32 %v108_v27, 0.0 }
 0x160   :  { %v100_v29 = vpop.xlane.xlu0 %99 }
 0x161   :  { %113 = vst.msk [vmem:[%s209_s5] sm:$0xff] %vm112_vm2, %v110_v28  ;;  %v109_v30 = vadd.f32 %v122_v25, %v100_v29 }
 0x163   :  { %v111_v31 = vmax.f32 %v109_v30, 0.0 }
 0x165   :  { %114 = vst.msk [vmem:[%s209_s5 + $0x8] sm:$0xff] %vm112_vm2, %v111_v31 }

// kernel: model_forward.5
= control target key start
LH: loop header
LB: loop body
LE: loop exit
PB: predicated region body
PF: predicated region fallthrough
CT: control target
= control target key end

     0   :  { %9 = vsyncpa [#allocation3], 0  ;;  %s767_s15 = smov 0   ;;  %s870_s0 = inlined_call_operand.vmem [shape: f32[2,8,32], index: 0, kind: input, shape index: {}]   ;;  %s871_s1 = inlined_call_operand.vmem [shape: f32[1,8,32], index: 1, kind: input, shape index: {}]   ;;  %s872_s2 = inlined_call_operand.vmem [shape: f32[2,32,32], index: 2, kind: input, shape index: {}]   ;;  %s873_s3 = inlined_call_operand.hbm [shape: f32[2,32,32], index: 3, kind: input, shape index: {}]   ;;  %s874_s4 = inlined_call_operand.vmem [shape: f32[2,8,32], index: 4, kind: output, shape index: {}]  }
   0x1 LB: > { %s773_s16 = sadd.s32 4294967295, %s735_s15   ;;  %p593_p0 = scmp.ge.s32.totalorder %s735_s15, 1  ;;  %s735_s15 = sphi %s767_s15, %s15_s15  }
   0x2   : > { %p135_p1 = scmp.lt.s32.totalorder %s735_s15, 3  ;;  %s737_s17 = smov [#allocation2]  }
   0x3   : > { %s153_s18 = sshll.u32 %s737_s17, 4  ;;  %p680_p3 = scmp.eq.s32.totalorder %s773_s16, 0  ;;  %s154_s18 = int_to_ptr.vmem [resolvable:$true] %s153_s18 }
   0x4   : > { %p777_p2 = pnand %p593_p0, %p135_p1  ;;  %s710_s20 = scalar_lea.vmem %s154_s18, 1024 }
   0x5   : > { %p711_p7 = scmp.ne.s32.totalorder %s154_s18, %s710_s20  ;;  %p718_p10 = scmp.lt.s32.totalorder %s154_s18, %s154_s18 }
   0x6   : > { %p676_p4 = pneg %p777_p2  ;;  %p719_p11 = scmp.lt.s32.totalorder %s710_s20, %s710_s20 }
   0x8   : > { %p677_p5 = pnand %p680_p3, %p676_p4  ;;  %p720_p12 = por %p719_p11, %p718_p10 }
   0xa   : > { %p701_p6 = pneg %p677_p5 }
   0xc   : > { %p713_p8 = pnand %p711_p7, %p701_p6 }
   0xe   : > { %p714_p9 = pneg %p713_p8 }
  0x10   : > { %p721_p13 = pnand %p720_p12, %p714_p9 }
  0x12   : > { %724 = shalt.err (!%p721_p13)
}
  0x13   : > { %s738_s21 = smov 128   ;;  %s739_s22 = smov 8  }
  0x14   : > { %679 = dma.hbm_to_vmem [thread:$0]  (!%p677_p5), %s873_s3, 1024, %s154_s18, [#allocation3], %s738_s21, %s738_s21, %s739_s22  }
  0x15   : > { %176 = sbr.rel (%p777_p2) target bundleno = 1403 (0x57b), region = 36 }
  0x1a   : > { %730 = dma.done.wait (%p680_p3), [#allocation3], 1024  }
  0x1b   : > { %732 = vsyncadd (%p680_p3), [#allocation3], 4294966272  ;;  %p200_p0 = scmp.lt.s32.totalorder %s773_s16, 1  ;;  %v740_v0 = vmov 0.0   ;;  %vm741_vm0 = vmmov 0   ;;  %v214_v1 = vld [vmem:[%s872_s2 + $0x10] sm:$0xff] }
  0x1c   : > { %628 = vmatprep.subr.bf16.mxu0 %v740_v0  ;;  %632 = vmatprep.mubr.msk.bf16.mxu0 %vm741_vm0, %v740_v0  ;;  %v215_v2 = vld [vmem:[%s872_s2 + $0x18] sm:$0xff]  ;;  %v212_v3 = vld [vmem:[%s872_s2] sm:$0xff]  ;;  %v213_v5 = vld [vmem:[%s872_s2 + $0x8] sm:$0xff]  ;;  %vm219_vm1 = vcmask 261120   ;;  %vm379_vm4 = vcmask 1043456   ;;  %vm375_vm5 = vcmask 64512  }
  0x1d   : > { %s877_s16 = smov (!%p200_p0, %s773_s16), 1  ;;  %636 = vmatprep.subr.bf16.mxu1 %v740_v0  ;;  %640 = vmatprep.mubr.msk.bf16.mxu1 %vm741_vm0, %v740_v0  ;;  %v218_v4 = vpack.c.bf16 %v215_v2, %v214_v1  ;;  %v210_v7 = vld [vmem:[%s871_s1] sm:$0xff]  ;;  %v603_v9 = vld [vmem:[%s872_s2 + $0x30] sm:$0xff]  ;;  %v604_v10 = vld [vmem:[%s872_s2 + $0x38] sm:$0xff]  ;;  %v217_v11 = vpack.c.bf16 %v213_v5, %v212_v3 }
  0x1e   : > { %s598_s25 = sshll.u32 %s877_s16, 3  ;;  %v271_v12 = vpack.c.bf16 %v604_v10, %v603_v9  ;;  %v601_v14 = vld [vmem:[%s872_s2 + $0x20] sm:$0xff]  ;;  %v602_v15 = vld [vmem:[%s872_s2 + $0x28] sm:$0xff]  ;;  %v424_v42 = vld [vmem:[#allocation2 + $0x10] sm:$0xff] }
  0x1f   : > { %s203_s28 = scalar_lea.vmem %s870_s0, %s598_s25  ;;  %629 = vmatpush3.bf16.msra.mxu0 %v218_v4  ;;  %v270_v16 = vpack.c.bf16 %v602_v15, %v601_v14  ;;  %v425_v43 = vld [vmem:[#allocation2 + $0x18] sm:$0xff]  ;;  %v422_v50 = vld [vmem:[#allocation2] sm:$0xff]  ;;  %v423_v51 = vld [vmem:[#allocation2 + $0x8] sm:$0xff]  ;;  %s207_s26 = scalar_lea.vmem %s874_s4, %s598_s25 }
  0x20   : > { %v209_v6 = vld [vmem:[%s203_s28] sm:$0xff]  ;;  %630 = vmatprep.subr.bf16.mxu0 %v740_v0  ;;  %637 = vmatpush3.bf16.msra.mxu1 %v271_v12  ;;  %v428_v44 = vpack.c.bf16 %v425_v43, %v424_v42  ;;  %v427_v52 = vpack.c.bf16 %v423_v51, %v422_v50  ;;  %v476_v53 = vld [vmem:[#allocation2 + $0x30] sm:$0xff]  ;;  %v477_v54 = vld [vmem:[#allocation2 + $0x38] sm:$0xff] }
  0x21   : > { %v211_v8 = vadd.f32 %v210_v7, %v209_v6  ;;  %638 = vmatprep.subr.bf16.mxu1 %v740_v0  ;;  %v480_v55 = vpack.c.bf16 %v477_v54, %v476_v53  ;;  %v474_v61 = vld [vmem:[#allocation2 + $0x20] sm:$0xff]  ;;  %v475_v62 = vld [vmem:[#allocation2 + $0x28] sm:$0xff] }
  0x22   : > { %v479_v63 = vpack.c.bf16 %v475_v62, %v474_v61 }
  0x23   : > { %v216_v13 = vpack.c.bf16 %v211_v8, %v211_v8  ;;  %631 = vmatpush3.bf16.msra.mxu0 %v217_v11 }
  0x24   : > { %644 = vmatprep.subr.bf16.mxu0 %v740_v0  ;;  %639 = vmatpush3.bf16.msra.mxu1 %v270_v16 }
  0x25   : > { %650 = vmatprep.subr.bf16.mxu1 %v740_v0 }
  0x26   : > { %633 = vmatmul.mubr.msk.bf16.vlgmr.msra.gmra.mxu0 %vm219_vm1, %v216_v13 }
  0x27   : > { %646 = vmatprep.mubr.msk.bf16.mxu0 %vm741_vm0, %v740_v0 }
  0xe6   : > { %v257_v17 = vpop.f32.mrf.mxu0 }
  0xe7   : > { %v263_v18 = vmax.f32 %v257_v17, 0.0 }
  0xe8   : > { %v634_v19 = vpop.f32.mrf.mxu0 }
  0xe9   : > { %v269_v20 = vpack.c.bf16 %v263_v18, %v263_v18 }
  0xea   : > { %v260_v21 = vpop.f32.mrf.mxu0 }
  0xeb   : > { %641 = vmatmul.mubr.msk.bf16.vlgmr.msra.gmra.mxu1 %vm219_vm1, %v269_v20 }
  0xec   : > { %v635_v22 = vpop.f32.mrf.mxu0  ;;  %652 = vmatprep.mubr.msk.bf16.mxu1 %vm741_vm0, %v740_v0 }
 0x1ab   : > { %v309_v23 = vpop.f32.mrf.mxu1 }
 0x1ac   : > { %v315_v24 = vmax.f32 %v309_v23, 0.0 }
 0x1ad   : > { %v642_v25 = vpop.f32.mrf.mxu1 }
 0x1ae   : > { %v316_v26 = vmul.f32 %v315_v24, %v315_v24 }
 0x1af   : > { %v312_v27 = vpop.f32.mrf.mxu1 }
 0x1b0   : > { %v317_v28 = vsel %vm219_vm1, %v316_v26, 0.0 }
 0x1b1   : > { %v643_v29 = vpop.f32.mrf.mxu1  ;;  %318 = vadd.xlane.f32.xlu0 %v317_v28 }
 0x23a   : > { %v319_v30 = vpop.xlane.xlu0 %318 }
 0x23b   : > { %695 = vrsqrt.f32 %v319_v30  ;;  %vm322_vm2 = vcmp.eq.f32.partialorder %v319_v30, inf  ;;  %v325_v33 = vand.u32 2147483648, %v319_v30  ;;  %vm324_vm3 = vcmp.eq.f32.partialorder %v319_v30, 0.0 }
 0x248   : > { %v696_v31 = vpop.eup %695 }
 0x249   : > { %v321_v32 = vmul.f32 %v696_v31, %v319_v30 }
 0x24b   : > { %v323_v34 = vsel %vm322_vm2, %v319_v30, %v321_v32 }
 0x24c   : > { %v326_v35 = vsel %vm324_vm3, %v325_v33, %v323_v34 }
 0x24d   : > { %v327_v36 = vadd.f32 1e-06, %v326_v35 }
 0x24f   : > { %697 = vrcp.f32 %v327_v36 }
 0x25c   : > { %v698_v37 = vpop.eup %697 }
 0x25d   : > { %v329_v38 = vmul.f32 %v698_v37, %v315_v24 }
 0x25f   : > { %v330_v39 = vpack.c.bf16 %v329_v38, %v329_v38 }
 0x261   : > { %v332_v40 = vsel %vm219_vm1, %v330_v39, 0  ;;  %v380_v41 = vsel %vm379_vm4, %v330_v39, 0 }
 0x262   : > { %645 = vmatpush3.bf16.xpose.msra.mxu0 %v332_v40  ;;  %651 = vmatpush3.bf16.msra.mxu1 %v380_v41 }
 0x263   : > { %656 = vmatprep.subr.bf16.mxu0 %v740_v0  ;;  %664 = vmatprep.subr.bf16.mxu1 %v740_v0 }
 0x269   : > { %647 = vmatmul.mubr.msk.bf16.vlgmr.msra.gmra.mxu0 %vm219_vm1, %v330_v39 }
 0x26a   : > { %660 = vmatprep.mubr.msk.bf16.mxu0 %vm741_vm0, %v740_v0  ;;  %657 = vmatpush3.bf16.msra.mxu0 %v428_v44 }
 0x26b   : > { %658 = vmatprep.subr.bf16.mxu0 %v740_v0 }
 0x26e   : > { %659 = vmatpush3.bf16.msra.mxu0 %v427_v52 }
 0x329   : > { %v368_v45 = vpop.f32.mrf.mxu0 }
 0x32a   : > { %v374_v46 = vpack.c.bf16 %v368_v45, %v368_v45 }
 0x32b   : > { %v648_v47 = vpop.f32.mrf.mxu0 }
 0x32c   : > { %653 = vmatmul.mubr.msk.bf16.vlgmr.msra.gmra.mxu1 %vm375_vm5, %v374_v46 }
 0x32d   : > { %v371_v48 = vpop.f32.mrf.mxu0  ;;  %668 = vmatprep.mubr.msk.bf16.mxu1 %vm741_vm0, %v740_v0  ;;  %665 = vmatpush3.bf16.msra.mxu1 %v480_v55 }
 0x32e   : > { %666 = vmatprep.subr.bf16.mxu1 %v740_v0 }
 0x32f   : > { %v649_v49 = vpop.f32.mrf.mxu0 }
 0x331   : > { %667 = vmatpush3.bf16.msra.mxu1 %v479_v63 }
 0x3ec   : > { %v416_v56 = vpop.f32.mrf.mxu1 }
 0x3ed   : > { %v426_v57 = vpack.c.bf16 %v416_v56, %v416_v56 }
 0x3ee   : > { %v654_v58 = vpop.f32.mrf.mxu1 }
 0x3ef   : > { %661 = vmatmul.mubr.msk.bf16.vlgmr.msra.gmra.mxu0 %vm219_vm1, %v426_v57 }
 0x3f0   : > { %v419_v59 = vpop.f32.mrf.mxu1 }
 0x3f2   : > { %v655_v60 = vpop.f32.mrf.mxu1 }
 0x4af   : > { %v466_v1 = vpop.f32.mrf.mxu0 }
 0x4b0   : > { %v472_v2 = vmax.f32 %v466_v1, 0.0 }
 0x4b1   : > { %v662_v3 = vpop.f32.mrf.mxu0 }
 0x4b2   : > { %v478_v4 = vpack.c.bf16 %v472_v2, %v472_v2 }
 0x4b3   : > { %v469_v5 = vpop.f32.mrf.mxu0 }
 0x4b4   : > { %669 = vmatmul.mubr.msk.bf16.vlgmr.msra.gmra.mxu1 %vm219_vm1, %v478_v4 }
 0x4b5   : > { %v663_v0 = vpop.f32.mrf.mxu0 }
 0x574   : > { %v518_v6 = vpop.f32.mrf.mxu1 }
 0x575   : > { %v524_v7 = vmax.f32 %v518_v6, 0.0 }
 0x576   : > { %v670_v8 = vpop.f32.mrf.mxu1 }
 0x577   : > { %525 = vst.msk [vmem:[%s207_s26] sm:$0xff] %vm219_vm1, %v524_v7 }
 0x578   : > { %v521_v9 = vpop.f32.mrf.mxu1 }
 0x57a   : > { %v671_v10 = vpop.f32.mrf.mxu1 }
 0x57b PF: > { %s15_s15 = sadd.s32 1, %s735_s15  }
 0x57c   : > { %p12_p1 = scmp.ge.s32.totalorder %s15_s15, 4  }
 0x57e   :  { %14 = sbr.rel (!%p12_p1) target bundleno = 1 (0x1), region = 73 }
 0x583   :  { %545 = vsyncpa [#allocation3], 1 }
 0x584   :  { %547 = vsyncpa [#allocation3 + $0x1], 1 }

// kernel: model_forward.6
= control target key start
LH: loop header
LB: loop body
LE: loop exit
PB: predicated region body
PF: predicated region fallthrough
CT: control target
= control target key end

     0   :  { %s696_s15 = smov 0   ;;  %s801_s0 = inlined_call_operand.vmem [shape: f32[2,8,32], index: 0, kind: input, shape index: {}]   ;;  %s802_s1 = inlined_call_operand.vmem [shape: f32[1,8,32], index: 1, kind: input, shape index: {}]   ;;  %s803_s2 = inlined_call_operand.vmem [shape: f32[2,32,32], index: 2, kind: input, shape index: {}]   ;;  %s804_s3 = inlined_call_operand.vmem [shape: f32[2,32,32], index: 3, kind: input, shape index: {}]   ;;  %s805_s4 = inlined_call_operand.vmem [shape: f32[2,8,32], index: 4, kind: output, shape index: {}]  }
   0x1 LB: > { %s564_s16 = sadd.s32 4294967295, %s667_s15   ;;  %p568_p0 = scmp.ge.s32.totalorder %s667_s15, 1  ;;  %s667_s15 = sphi %s696_s15, %s14_s15  }
   0x2   : > { %p161_p1 = scmp.lt.s32.totalorder %s667_s15, 3 }
   0x4   : > { %p162_p2 = pnand %p568_p0, %p161_p1 }
   0x5   : > { %p185_p3 = scmp.lt.s32.totalorder (!%p162_p2), %s564_s16, 1 }
   0x6   : > { %165 = sbr.rel (%p162_p2) target bundleno = 1386 (0x56a), region = 36 }
   0xb   : > { %v199_v0 = vld [vmem:[%s803_s2 + $0x10] sm:$0xff]  ;;  %v200_v1 = vld [vmem:[%s803_s2 + $0x18] sm:$0xff]  ;;  %v197_v2 = vld [vmem:[%s803_s2] sm:$0xff]  ;;  %v669_v3 = vmov 0.0   ;;  %vm670_vm0 = vmmov 0   ;;  %s807_s16 = smov (!%p185_p3, %s564_s16), 1 }
   0xc   : > { %603 = vmatprep.subr.bf16.mxu0 %v669_v3  ;;  %v203_v4 = vpack.c.bf16 %v200_v1, %v199_v0  ;;  %v198_v5 = vld [vmem:[%s803_s2 + $0x8] sm:$0xff]  ;;  %607 = vmatprep.mubr.msk.bf16.mxu0 %vm670_vm0, %v669_v3  ;;  %v574_v6 = vld [vmem:[%s803_s2 + $0x30] sm:$0xff]  ;;  %v575_v7 = vld [vmem:[%s803_s2 + $0x38] sm:$0xff]  ;;  %s569_s29 = sshll.u32 %s807_s16, 3  ;;  %vm204_vm1 = vcmask 261120   ;;  %vm364_vm4 = vcmask 1043456  }
   0xd   : > { %611 = vmatprep.subr.bf16.mxu1 %v669_v3  ;;  %615 = vmatprep.mubr.msk.bf16.mxu1 %vm670_vm0, %v669_v3  ;;  %v202_v8 = vpack.c.bf16 %v198_v5, %v197_v2  ;;  %v256_v9 = vpack.c.bf16 %v575_v7, %v574_v6  ;;  %v195_v10 = vld [vmem:[%s802_s1] sm:$0xff]  ;;  %s188_s8 = scalar_lea.vmem %s801_s0, %s569_s29  ;;  %v573_v15 = vld [vmem:[%s803_s2 + $0x28] sm:$0xff]  ;;  %v409_v42 = vld [vmem:[%s804_s3 + $0x10] sm:$0xff]  ;;  %vm360_vm5 = vcmask 64512  }
   0xe   : > { %604 = vmatpush3.bf16.msra.mxu0 %v203_v4  ;;  %v194_v11 = vld [vmem:[%s188_s8] sm:$0xff]  ;;  %v410_v43 = vld [vmem:[%s804_s3 + $0x18] sm:$0xff]  ;;  %v408_v51 = vld [vmem:[%s804_s3 + $0x8] sm:$0xff]  ;;  %s192_s8 = scalar_lea.vmem %s805_s4, %s569_s29 }
   0xf   : > { %605 = vmatprep.subr.bf16.mxu0 %v669_v3  ;;  %612 = vmatpush3.bf16.msra.mxu1 %v256_v9  ;;  %v196_v12 = vadd.f32 %v195_v10, %v194_v11  ;;  %v572_v14 = vld [vmem:[%s803_s2 + $0x20] sm:$0xff]  ;;  %v413_v44 = vpack.c.bf16 %v410_v43, %v409_v42  ;;  %v582_v53 = vld [vmem:[%s804_s3 + $0x30] sm:$0xff]  ;;  %v583_v54 = vld [vmem:[%s804_s3 + $0x38] sm:$0xff] }
  0x10   : > { %613 = vmatprep.subr.bf16.mxu1 %v669_v3  ;;  %v255_v16 = vpack.c.bf16 %v573_v15, %v572_v14  ;;  %v407_v50 = vld [vmem:[%s804_s3] sm:$0xff]  ;;  %v465_v55 = vpack.c.bf16 %v583_v54, %v582_v53  ;;  %v581_v62 = vld [vmem:[%s804_s3 + $0x28] sm:$0xff] }
  0x11   : > { %v201_v13 = vpack.c.bf16 %v196_v12, %v196_v12  ;;  %v412_v52 = vpack.c.bf16 %v408_v51, %v407_v50  ;;  %v580_v61 = vld [vmem:[%s804_s3 + $0x20] sm:$0xff] }
  0x12   : > { %606 = vmatpush3.bf16.msra.mxu0 %v202_v8  ;;  %v464_v63 = vpack.c.bf16 %v581_v62, %v580_v61 }
  0x13   : > { %619 = vmatprep.subr.bf16.mxu0 %v669_v3  ;;  %614 = vmatpush3.bf16.msra.mxu1 %v255_v16 }
  0x14   : > { %625 = vmatprep.subr.bf16.mxu1 %v669_v3 }
  0x15   : > { %608 = vmatmul.mubr.msk.bf16.vlgmr.msra.gmra.mxu0 %vm204_vm1, %v201_v13 }
  0x16   : > { %621 = vmatprep.mubr.msk.bf16.mxu0 %vm670_vm0, %v669_v3 }
  0xd5   : > { %v242_v17 = vpop.f32.mrf.mxu0 }
  0xd6   : > { %v248_v18 = vmax.f32 %v242_v17, 0.0 }
  0xd7   : > { %v609_v19 = vpop.f32.mrf.mxu0 }
  0xd8   : > { %v254_v20 = vpack.c.bf16 %v248_v18, %v248_v18 }
  0xd9   : > { %v245_v21 = vpop.f32.mrf.mxu0 }
  0xda   : > { %616 = vmatmul.mubr.msk.bf16.vlgmr.msra.gmra.mxu1 %vm204_vm1, %v254_v20 }
  0xdb   : > { %v610_v22 = vpop.f32.mrf.mxu0  ;;  %627 = vmatprep.mubr.msk.bf16.mxu1 %vm670_vm0, %v669_v3 }
 0x19a   : > { %v294_v23 = vpop.f32.mrf.mxu1 }
 0x19b   : > { %v300_v24 = vmax.f32 %v294_v23, 0.0 }
 0x19c   : > { %v617_v25 = vpop.f32.mrf.mxu1 }
 0x19d   : > { %v301_v26 = vmul.f32 %v300_v24, %v300_v24 }
 0x19e   : > { %v297_v27 = vpop.f32.mrf.mxu1 }
 0x19f   : > { %v302_v28 = vsel %vm204_vm1, %v301_v26, 0.0 }
 0x1a0   : > { %v618_v29 = vpop.f32.mrf.mxu1  ;;  %303 = vadd.xlane.f32.xlu0 %v302_v28 }
 0x229   : > { %v304_v30 = vpop.xlane.xlu0 %303 }
 0x22a   : > { %657 = vrsqrt.f32 %v304_v30  ;;  %vm307_vm2 = vcmp.eq.f32.partialorder %v304_v30, inf  ;;  %v310_v33 = vand.u32 2147483648, %v304_v30  ;;  %vm309_vm3 = vcmp.eq.f32.partialorder %v304_v30, 0.0 }
 0x237   : > { %v658_v31 = vpop.eup %657 }
 0x238   : > { %v306_v32 = vmul.f32 %v658_v31, %v304_v30 }
 0x23a   : > { %v308_v34 = vsel %vm307_vm2, %v304_v30, %v306_v32 }
 0x23b   : > { %v311_v35 = vsel %vm309_vm3, %v310_v33, %v308_v34 }
 0x23c   : > { %v312_v36 = vadd.f32 1e-06, %v311_v35 }
 0x23e   : > { %659 = vrcp.f32 %v312_v36 }
 0x24b   : > { %v660_v37 = vpop.eup %659 }
 0x24c   : > { %v314_v38 = vmul.f32 %v660_v37, %v300_v24 }
 0x24e   : > { %v315_v39 = vpack.c.bf16 %v314_v38, %v314_v38 }
 0x250   : > { %v317_v40 = vsel %vm204_vm1, %v315_v39, 0  ;;  %v365_v41 = vsel %vm364_vm4, %v315_v39, 0 }
 0x251   : > { %620 = vmatpush3.bf16.xpose.msra.mxu0 %v317_v40  ;;  %626 = vmatpush3.bf16.msra.mxu1 %v365_v41 }
 0x252   : > { %631 = vmatprep.subr.bf16.mxu0 %v669_v3  ;;  %639 = vmatprep.subr.bf16.mxu1 %v669_v3 }
 0x258   : > { %622 = vmatmul.mubr.msk.bf16.vlgmr.msra.gmra.mxu0 %vm204_vm1, %v315_v39 }
 0x259   : > { %635 = vmatprep.mubr.msk.bf16.mxu0 %vm670_vm0, %v669_v3  ;;  %632 = vmatpush3.bf16.msra.mxu0 %v413_v44 }
 0x25a   : > { %633 = vmatprep.subr.bf16.mxu0 %v669_v3 }
 0x25d   : > { %634 = vmatpush3.bf16.msra.mxu0 %v412_v52 }
 0x318   : > { %v353_v45 = vpop.f32.mrf.mxu0 }
 0x319   : > { %v359_v46 = vpack.c.bf16 %v353_v45, %v353_v45 }
 0x31a   : > { %v623_v47 = vpop.f32.mrf.mxu0 }
 0x31b   : > { %628 = vmatmul.mubr.msk.bf16.vlgmr.msra.gmra.mxu1 %vm360_vm5, %v359_v46 }
 0x31c   : > { %v356_v48 = vpop.f32.mrf.mxu0  ;;  %643 = vmatprep.mubr.msk.bf16.mxu1 %vm670_vm0, %v669_v3  ;;  %640 = vmatpush3.bf16.msra.mxu1 %v465_v55 }
 0x31d   : > { %641 = vmatprep.subr.bf16.mxu1 %v669_v3 }
 0x31e   : > { %v624_v49 = vpop.f32.mrf.mxu0 }
 0x320   : > { %642 = vmatpush3.bf16.msra.mxu1 %v464_v63 }
 0x3db   : > { %v401_v56 = vpop.f32.mrf.mxu1 }
 0x3dc   : > { %v411_v57 = vpack.c.bf16 %v401_v56, %v401_v56 }
 0x3dd   : > { %v629_v58 = vpop.f32.mrf.mxu1 }
 0x3de   : > { %636 = vmatmul.mubr.msk.bf16.vlgmr.msra.gmra.mxu0 %vm204_vm1, %v411_v57 }
 0x3df   : > { %v404_v59 = vpop.f32.mrf.mxu1 }
 0x3e1   : > { %v630_v60 = vpop.f32.mrf.mxu1 }
 0x49e   : > { %v451_v0 = vpop.f32.mrf.mxu0 }
 0x49f   : > { %v457_v1 = vmax.f32 %v451_v0, 0.0 }
 0x4a0   : > { %v637_v2 = vpop.f32.mrf.mxu0 }
 0x4a1   : > { %v463_v3 = vpack.c.bf16 %v457_v1, %v457_v1 }
 0x4a2   : > { %v454_v4 = vpop.f32.mrf.mxu0 }
 0x4a3   : > { %644 = vmatmul.mubr.msk.bf16.vlgmr.msra.gmra.mxu1 %vm204_vm1, %v463_v3 }
 0x4a4   : > { %v638_v5 = vpop.f32.mrf.mxu0 }
 0x563   : > { %v503_v6 = vpop.f32.mrf.mxu1 }
 0x564   : > { %v509_v7 = vmax.f32 %v503_v6, 0.0 }
 0x565   : > { %v645_v8 = vpop.f32.mrf.mxu1 }
 0x566   : > { %510 = vst.msk [vmem:[%s192_s8] sm:$0xff] %vm204_vm1, %v509_v7 }
 0x567   : > { %v506_v9 = vpop.f32.mrf.mxu1 }
 0x569   : > { %v646_v10 = vpop.f32.mrf.mxu1 }
 0x56a PF: > { %s14_s15 = sadd.s32 1, %s667_s15  }
 0x56b   : > { %p11_p4 = scmp.ge.s32.totalorder %s14_s15, 4  }
 0x56d   :  { %13 = sbr.rel (!%p11_p4) target bundleno = 1 (0x1), region = 68 }

</bundles_post_ra>
